<compile_context>
chip_gen: v5e
topology: v5e:2x2
jax: 0.10.0
libtpu: 0.0.40
codegen_flags: <defaults>
</compile_context>

<pallas_src>
import functools

import jax
import jax.numpy as jnp
from jax import lax
from jax.experimental import pallas as pl
from jax.experimental.pallas import tpu as pltpu


def _fermi_dirac_kernel(x_ref, w1_ref, b1_ref, w2_ref, b2_ref, o_ref, *, inv_temp):
    """Fused MLP + Fermi-Dirac head on one batch tile.

    x_ref  : [tm, Din]  input features, natural layout (batch on sublanes)
    w1_ref : [Hp, Din]  first Linear weight (torch [out, in] layout, zero-padded)
    b1_ref : [Hp, 1]    first Linear bias (column, broadcast over lanes)
    w2_ref : [Hp, 1]    second Linear weight as a column (zero-padded)
    b2_ref : [1]        second Linear bias (SMEM scalar)
    o_ref  : [1, tm]    lane-dense output row (batch on lanes)
    """
    # h^T = W1 @ x^T : contract W1's in-dim with x's feature dim -> [Hp, tm].
    h = lax.dot_general(
        w1_ref[...], x_ref[...],
        dimension_numbers=(((1,), (1,)), ((), ())),
        preferred_element_type=jnp.float32,
    )
    h = h + b1_ref[...]
    # LeakyReLU(negative_slope=0.1)
    h = jnp.where(h >= 0.0, h, 0.1 * h)
    # Second Linear (H -> 1): broadcast-multiply + sublane reduce -> [1, tm].
    y = jnp.sum(w2_ref[...] * h, axis=0, keepdims=True) + b2_ref[0]
    # abs, clamp(0, 40), Fermi-Dirac: 1/(exp((y-2)/T)+1) == sigmoid((2-y)/T).
    y = jnp.clip(jnp.abs(y), 0.0, 40.0)
    o_ref[...] = jax.nn.sigmoid((2.0 - y) * inv_temp)


def _pick_tm(B, tm_max=4096, min_steps=8):
    """Largest lane tile <= tm_max, multiple of 128, keeping >= min_steps grid steps."""
    tm = min(tm_max, max(128, pl.cdiv(B, min_steps)))
    tm = ((tm + 127) // 128) * 128
    return tm


def fermi_dirac_decoder(x, W1, b1, W2, b2, *, temperature=0.5, tm=None):
    """FermiDiracDecoder forward.

    x  : [B, Din]
    W1 : [H, Din], b1 : [H]     (torch nn.Linear layout)
    W2 : [1, H],   b2 : [1]
    returns [B, 1]
    """
    B, Din = x.shape
    H = W1.shape[0]
    Hp = ((H + 7) // 8) * 8  # pad hidden dim; padded rows/cols are exact zeros

    # Padded/reshaped weights (tiny; const-folded under jit).
    W1p = jnp.zeros((Hp, Din), jnp.float32).at[:H, :].set(W1.astype(jnp.float32))
    b1p = jnp.zeros((Hp, 1), jnp.float32).at[:H, 0].set(b1.astype(jnp.float32))
    w2c = jnp.zeros((Hp, 1), jnp.float32).at[:H, 0].set(W2[0].astype(jnp.float32))
    b2v = jnp.asarray(b2, jnp.float32).reshape(1,)

    if tm is None:
        tm = _pick_tm(B)
    Bp = pl.cdiv(B, tm) * tm

    xin = x.astype(jnp.float32)
    if Bp != B:
        # Zero-pad only the batch tail so padded lanes stay finite (no NaNs).
        xin = jnp.pad(xin, ((0, Bp - B), (0, 0)))

    kernel = functools.partial(_fermi_dirac_kernel, inv_temp=1.0 / float(temperature))

    out_row = pl.pallas_call(
        kernel,
        out_shape=jax.ShapeDtypeStruct((1, Bp), jnp.float32),
        grid=(Bp // tm,),
        in_specs=[
            pl.BlockSpec((tm, Din), lambda i: (i, 0)),   # x tile, natural layout
            pl.BlockSpec((Hp, Din), lambda i: (0, 0)),   # W1 (resident every step)
            pl.BlockSpec((Hp, 1), lambda i: (0, 0)),     # b1 column
            pl.BlockSpec((Hp, 1), lambda i: (0, 0)),     # w2 column
            pl.BlockSpec(memory_space=pltpu.MemorySpace.SMEM),  # b2 scalar
        ],
        out_specs=pl.BlockSpec((1, tm), lambda i: (0, i)),  # lane-dense output row
        compiler_params=pltpu.CompilerParams(
            dimension_semantics=("parallel",),
        ),
    )(xin, W1p, b1p, w2c, b2v)

    return out_row[0, :B].reshape(B, 1)


def fermi_dirac_reference(x, W1, b1, W2, b2, temperature=0.5):
    """Pure-JAX reference mirroring the PyTorch module."""
    h = x @ W1.T + b1
    h = jnp.where(h >= 0.0, h, 0.1 * h)
    y = h @ W2.T + b2
    y = jnp.clip(jnp.abs(y), 0.0, 40.0)
    return 1.0 / (jnp.exp((y - 2.0) / temperature) + 1.0)


if __name__ == "__main__":
    batch = 256
    input_dim = 32
    hidden_dim = 25
    temperature = 0.5

    key = jax.random.PRNGKey(0)
    kx, k1, k2, k3, k4 = jax.random.split(key, 5)

    x = jax.random.normal(kx, (batch, input_dim), jnp.float32)

    s1 = 1.0 / jnp.sqrt(jnp.float32(input_dim))
    W1 = jax.random.uniform(k1, (hidden_dim, input_dim), jnp.float32, -s1, s1)
    b1 = jax.random.uniform(k2, (hidden_dim,), jnp.float32, -s1, s1)
    s2 = 1.0 / jnp.sqrt(jnp.float32(hidden_dim))
    W2 = jax.random.uniform(k3, (1, hidden_dim), jnp.float32, -s2, s2)
    b2 = jax.random.uniform(k4, (1,), jnp.float32, -s2, s2)

    # jit the whole decoder so the (tiny) weight padding is const-folded/fused.
    decoder = jax.jit(functools.partial(fermi_dirac_decoder, temperature=temperature))

    out = decoder(x, W1, b1, W2, b2)
    jax.block_until_ready(out)

    ref = fermi_dirac_reference(x, W1, b1, W2, b2, temperature)

    assert out.shape == (batch, 1)
    assert bool(jnp.all((out > 0.0) & (out <= 1.0)))  # Fermi-Dirac range
    assert bool(jnp.allclose(out, ref, rtol=1e-5, atol=1e-5)), float(
        jnp.max(jnp.abs(out - ref))
    )
    print("KERNEL_OK")
</pallas_src>

<mosaic_0001>
module attributes {stable_mosaic.version = 11 : i64} {
  func.func @_fermi_dirac_kernel(%arg0: i32, %arg1: memref<128x32xf32, #tpu.memory_space<vmem>>, %arg2: memref<32x32xf32, #tpu.memory_space<vmem>>, %arg3: memref<32x1xf32, #tpu.memory_space<vmem>>, %arg4: memref<32x1xf32, #tpu.memory_space<vmem>>, %arg5: memref<1xf32, #tpu.memory_space<smem>>, %arg6: memref<1x128xf32, #tpu.memory_space<vmem>>) attributes {dimension_semantics = [#tpu.dimension_semantics<parallel>], iteration_bounds = array<i64: 2>, scalar_prefetch = 0 : i64, scratch_operands = 0 : i64, tpu.core_type = #tpu.core_type<tc>, window_params = [{transform_indices = @transform_0, window_bounds = array<i64: 128, 32>}, {pipeline_mode = #tpu.pipeline_mode<synchronous>, transform_indices = @transform_1, window_bounds = array<i64: 32, 32>}, {pipeline_mode = #tpu.pipeline_mode<synchronous>, transform_indices = @transform_2, window_bounds = array<i64: 32, 1>}, {pipeline_mode = #tpu.pipeline_mode<synchronous>, transform_indices = @transform_3, window_bounds = array<i64: 32, 1>}, {transform_indices = @transform_4, window_bounds = array<i64: 1>}, {transform_indices = @transform_5, window_bounds = array<i64: 1, 128>}]} {
    %c0 = arith.constant 0 : index
    %c0_0 = arith.constant 0 : index
    %0 = vector.load %arg2[%c0, %c0_0] : memref<32x32xf32, #tpu.memory_space<vmem>>, vector<32x32xf32>
    %c0_1 = arith.constant 0 : index
    %c0_2 = arith.constant 0 : index
    %1 = vector.load %arg1[%c0_1, %c0_2] : memref<128x32xf32, #tpu.memory_space<vmem>>, vector<128x32xf32>
    %cst = arith.constant dense<0.000000e+00> : vector<32x128xf32>
    %2 = tpu.matmul %0, %1, %cst {dimension_numbers = #tpu.dot_dimension_numbers<[1], [1], [0], [0], [0, 0, 1, 0], [], []>} : vector<32x32xf32>, vector<128x32xf32>, vector<32x128xf32> -> vector<32x128xf32>
    %c0_3 = arith.constant 0 : index
    %c0_4 = arith.constant 0 : index
    %3 = vector.load %arg3[%c0_3, %c0_4] : memref<32x1xf32, #tpu.memory_space<vmem>>, vector<32x1xf32>
    %4 = vector.broadcast %3 : vector<32x1xf32> to vector<32x128xf32>
    %5 = arith.addf %2, %4 : vector<32x128xf32>
    %cst_5 = arith.constant 0.000000e+00 : f32
    %6 = vector.broadcast %cst_5 : f32 to vector<32x128xf32>
    %7 = arith.cmpf oge, %5, %6 : vector<32x128xf32>
    %cst_6 = arith.constant 1.000000e-01 : f32
    %8 = vector.broadcast %cst_6 : f32 to vector<32x128xf32>
    %9 = arith.mulf %8, %5 : vector<32x128xf32>
    %10 = arith.select %7, %5, %9 : vector<32x128xi1>, vector<32x128xf32>
    %c0_7 = arith.constant 0 : index
    %c0_8 = arith.constant 0 : index
    %11 = vector.load %arg4[%c0_7, %c0_8] : memref<32x1xf32, #tpu.memory_space<vmem>>, vector<32x1xf32>
    %12 = vector.broadcast %11 : vector<32x1xf32> to vector<32x128xf32>
    %13 = arith.mulf %12, %10 : vector<32x128xf32>
    %cst_9 = arith.constant dense<0.000000e+00> : vector<128xf32>
    %14 = vector.multi_reduction <add>, %13, %cst_9 [0] : vector<32x128xf32> to vector<128xf32>
    %15 = vector.shape_cast %14 : vector<128xf32> to vector<1x128xf32>
    %c0_10 = arith.constant 0 : index
    %16 = memref.load %arg5[%c0_10] : memref<1xf32, #tpu.memory_space<smem>>
    %17 = vector.broadcast %16 : f32 to vector<1x128xf32>
    %18 = arith.addf %15, %17 : vector<1x128xf32>
    %19 = math.absf %18 : vector<1x128xf32>
    %cst_11 = arith.constant 0.000000e+00 : f32
    %cst_12 = arith.constant 4.000000e+01 : f32
    %20 = vector.broadcast %cst_11 : f32 to vector<1x128xf32>
    %21 = arith.maximumf %20, %19 : vector<1x128xf32>
    %22 = vector.broadcast %cst_12 : f32 to vector<1x128xf32>
    %23 = arith.minimumf %22, %21 : vector<1x128xf32>
    %cst_13 = arith.constant 2.000000e+00 : f32
    %24 = vector.broadcast %cst_13 : f32 to vector<1x128xf32>
    %25 = arith.subf %24, %23 : vector<1x128xf32>
    %cst_14 = arith.constant 2.000000e+00 : f32
    %26 = vector.broadcast %cst_14 : f32 to vector<1x128xf32>
    %27 = arith.mulf %25, %26 : vector<1x128xf32>
    %28 = arith.negf %27 : vector<1x128xf32>
    %29 = math.exp %28 : vector<1x128xf32>
    %cst_15 = arith.constant 1.000000e+00 : f32
    %30 = vector.broadcast %cst_15 : f32 to vector<1x128xf32>
    %31 = arith.addf %30, %29 : vector<1x128xf32>
    %32 = arith.divf %30, %31 : vector<1x128xf32>
    %c0_16 = arith.constant 0 : index
    %c0_17 = arith.constant 0 : index
    %33 = vector.load %arg6[%c0_16, %c0_17] : memref<1x128xf32, #tpu.memory_space<vmem>>, vector<1x128xf32>
    tpu.vector_store %arg6[%c0_16, %c0_17], %32 {strides = array<i32>} : memref<1x128xf32, #tpu.memory_space<vmem>>, vector<1x128xf32>,
    return
  }
  func.func @transform_0(%arg0: i32) -> (i32, i32) {
    %c0_i32 = arith.constant 0 : i32
    %c0_i32_0 = arith.constant 0 : i32
    return %arg0, %c0_i32 : i32, i32
  }
  func.func @transform_1(%arg0: i32) -> (i32, i32) {
    %c0_i32 = arith.constant 0 : i32
    %c0_i32_0 = arith.constant 0 : i32
    %c0_i32_1 = arith.constant 0 : i32
    return %c0_i32, %c0_i32_0 : i32, i32
  }
  func.func @transform_2(%arg0: i32) -> (i32, i32) {
    %c0_i32 = arith.constant 0 : i32
    %c0_i32_0 = arith.constant 0 : i32
    %c0_i32_1 = arith.constant 0 : i32
    return %c0_i32, %c0_i32_0 : i32, i32
  }
  func.func @transform_3(%arg0: i32) -> (i32, i32) {
    %c0_i32 = arith.constant 0 : i32
    %c0_i32_0 = arith.constant 0 : i32
    %c0_i32_1 = arith.constant 0 : i32
    return %c0_i32, %c0_i32_0 : i32, i32
  }
  func.func @transform_4(%arg0: i32) -> i32 {
    %c0_i32 = arith.constant 0 : i32
    %c0_i32_0 = arith.constant 0 : i32
    return %c0_i32 : i32
  }
  func.func @transform_5(%arg0: i32) -> (i32, i32) {
    %c0_i32 = arith.constant 0 : i32
    %c0_i32_0 = arith.constant 0 : i32
    return %c0_i32, %arg0 : i32, i32
  }
}

</mosaic_0001>

<bundles_post_ra>
// kernel: fermi_dirac_decoder.1
= control target key start
LH: loop header
LB: loop body
LE: loop exit
PB: predicated region body
PF: predicated region fallthrough
CT: control target
= control target key end

     0   :  { %s932_s0 = inlined_call_operand.vmem [shape: f32[256,32], index: 0, kind: input, shape index: {}]   ;;  %s933_s1 = inlined_call_operand.vmem [shape: f32[32,32], index: 1, kind: input, shape index: {}]   ;;  %s934_s2 = inlined_call_operand.vmem [shape: f32[32,1], index: 2, kind: input, shape index: {}]   ;;  %s935_s3 = inlined_call_operand.vmem [shape: f32[32,1], index: 3, kind: input, shape index: {}]   ;;  %s936_s4 = inlined_call_operand.<no memory space> [shape: f32[1], index: 4, kind: input, shape index: {}]   ;;  %s937_s5 = inlined_call_operand.hbm [shape: f32[1,256], index: 5, kind: output, shape index: {}]  }
   0x1   :  { %10 = sst [smem:[#allocation2]] %s936_s4 }
   0x2   :  { %11 = vsyncpa [#allocation4], 0 }
   0x3   :  { %13 = vsyncpa [#allocation4 + $0x1], 0  ;;  %s726_s20 = smov 0   ;;  %s728_s21 = smov 0  }
   0x4   :  { %s730_s22 = smov 0   ;;  %s732_s23 = smov 0  }
   0x5 LB: > { %s747_s4 = sadd.s32 4294967295, %s690_s23   ;;  %s504_s24 = sadd.s32 4294967294, %s690_s23   ;;  %s690_s23 = sphi %s732_s23, %s943_s23   ;;  %s686_s22 = sphi %s730_s22, %s942_s22   ;;  %s682_s21 = sphi %s728_s21, %s941_s21   ;;  %s678_s20 = sphi %s726_s20, %s940_s20  }
   0x6   : > { %s751_s25 = sadd.s32 1, %s690_s23   ;;  %s136_s26 = sadd.s32 1, %s686_s22 }
   0x7   : > { %s133_s27 = ssub.s32 %s690_s23, %s751_s25  ;;  %p146_p0 = scmp.ne.s32.totalorder %s686_s22, %s682_s21 }
   0x8   : > { %p134_p1 = scmp.eq.s32.totalorder %s133_s27, 0  ;;  %p147_p2 = scmp.eq.s32.totalorder %s747_s4, 1 }
   0x9   : > { %p152_p3 = scmp.ne.s32.totalorder %s682_s21, %s678_s20  ;;  %p153_p4 = scmp.eq.s32.totalorder %s504_s24, 1 }
   0xa   : > { %s762_s28 = scalar_select %p134_p1, %s686_s22, %s136_s26  }
   0xb   : > { %p764_p5 = por %p147_p2, %p146_p0  ;;  %p768_p6 = por %p153_p4, %p152_p3 }
   0xc   : > { %p507_p7 = scmp.ge.s32.totalorder %s690_s23, 1  ;;  %p192_p8 = scmp.lt.s32.totalorder %s690_s23, 3 }
   0xe   : > { %p193_p9 = pnand %p507_p7, %p192_p8 }
   0xf   : > { %s508_s6 = sshll.u32 (!%p193_p9), %s747_s4, 4  ;;  %s408_s18 = sld [smem:[#allocation2]] (!%p193_p9) }
  0x10   : > { %196 = sbr.rel (%p193_p9) target bundleno = 287 (0x11f), region = 40  ;;  %p220_p10 = scmp.lt.s32.totalorder (!%p193_p9), %s508_s6, 31 }
  0x11   : > { %s217_s19 = sand.u32 (!%p193_p9), 1, %s682_s21   ;;  %s445_s27 = scalar_lea.hbm (!%p193_p9), %s937_s5, %s747_s4 }
  0x12   : > { %s449_s8 = sshll.u32 (!%p193_p9), %s445_s27, 4  ;;  %s437_s9 = scalar_lea.sflag (!%p193_p9), [#allocation4], %s217_s19  ;;  %s450_s8 = int_to_ptr.hbm [resolvable:$true] %s449_s8 }
  0x13   : > { %s642_s4 = sshra.s32 (!%p193_p9), %s450_s8, 4  ;;  %s648_s14 = scalar_lea.hbm (!%p193_p9), %s937_s5, 2  ;;  %s643_s4 = int_to_ptr.hbm [resolvable:$true] %s642_s4 }
  0x14   : > { %s644_s11 = scalar_lea.hbm (!%p193_p9), %s643_s4, 1  ;;  %p649_p0 = scmp.lt.s32.totalorder (!%p193_p9), %s643_s4, %s937_s5 }
  0x15   : > { %s945_s6 = smov (!%p220_p10, %s508_s6), 31  ;;  %vm269_vm0 = vcmask 261120   ;;  %v692_v6 = vmov 0   ;;  %v245_v8 = vld [vmem:[%s934_s2] sm:$0xff]  ;;  %v247_v9 = vld [vmem:[%s934_s2 + $0x10] sm:$0xff]  ;;  %v246_v12 = vld [vmem:[%s934_s2 + $0x8] sm:$0xff]  ;;  %p645_p11 = scmp.ne.s32.totalorder %s643_s4, %s644_s11 }
  0x16   : > { %s509_s7 = sshll.u32 %s945_s6, 3  ;;  %621 = vset.pattern.permute.xlu0 %v692_v6  ;;  %622 = vset.pattern.permute.xlu1 %v692_v6  ;;  %v248_v13 = vld [vmem:[%s934_s2 + $0x18] sm:$0xff]  ;;  %v371_v14 = vld [vmem:[%s935_s3] sm:$0xff]  ;;  %v373_v16 = vld [vmem:[%s935_s3 + $0x10] sm:$0xff]  ;;  %s218_s6 = scalar_lea.vmem [#allocation3], %s217_s19 }
  0x17   : > { %s778_s10 = scalar_lea.vmem %s932_s0, %s509_s7  ;;  %623 = vset.pattern.permute.xlu2 %v692_v6  ;;  %251 = vperm.xlu0 %621, %v245_v8   ;;  %v374_v17 = vld [vmem:[%s935_s3 + $0x18] sm:$0xff]  ;;  %v372_v19 = vld [vmem:[%s935_s3 + $0x8] sm:$0xff]  ;;  %v225_v25 = vld [vmem:[%s933_s1] sm:$0xff]  ;;  %s447_s7 = sshll.u32 %s218_s6, 4  ;;  %s448_s7 = int_to_ptr.vmem [resolvable:$true] %s447_s7 }
  0x18   : > { %v244_v0 = vld [vmem:[%s778_s10 + $0x78] sm:$0xff]  ;;  %v243_v1 = vld [vmem:[%s778_s10 + $0x70] sm:$0xff]  ;;  %v242_v2 = vld [vmem:[%s778_s10 + $0x68] sm:$0xff]  ;;  %261 = vperm.xlu1 %622, %v247_v9   ;;  %377 = vperm.xlu2 %623, %v371_v14   ;;  %p646_p12 = pnand %p645_p11, %p764_p5  ;;  %p650_p1 = scmp.lt.s32.totalorder %s648_s14, %s644_s11 }
  0x19   : > { %510 = vmatpush.xpose.msk.msra.mxu0 %vm269_vm0, %v244_v0  ;;  %533 = vmatpush.xpose.msk.msra.mxu1 %vm269_vm0, %v244_v0  ;;  %v241_v3 = vld [vmem:[%s778_s10 + $0x60] sm:$0xff]  ;;  %v240_v4 = vld [vmem:[%s778_s10 + $0x58] sm:$0xff]  ;;  %v239_v5 = vld [vmem:[%s778_s10 + $0x50] sm:$0xff] }
  0x1a   : > { %534 = vmatpush.xpose.msk.msra.mxu2 %vm269_vm0, %v244_v0  ;;  %535 = vmatpush.xpose.msk.msra.mxu3 %vm269_vm0, %v244_v0  ;;  %v238_v7 = vld [vmem:[%s778_s10 + $0x48] sm:$0xff]  ;;  %v237_v10 = vld [vmem:[%s778_s10 + $0x40] sm:$0xff]  ;;  %v236_v11 = vld [vmem:[%s778_s10 + $0x38] sm:$0xff]  ;;  %p647_p13 = pneg %p646_p12  ;;  %p651_p2 = por %p650_p1, %p649_p0 }
  0x1b   : > { %v235_v15 = vld [vmem:[%s778_s10 + $0x30] sm:$0xff]  ;;  %v234_v18 = vld [vmem:[%s778_s10 + $0x28] sm:$0xff]  ;;  %v233_v20 = vld [vmem:[%s778_s10 + $0x20] sm:$0xff] }
  0x1c   : > { %v232_v21 = vld [vmem:[%s778_s10 + $0x18] sm:$0xff]  ;;  %v231_v22 = vld [vmem:[%s778_s10 + $0x10] sm:$0xff]  ;;  %v230_v23 = vld [vmem:[%s778_s10 + $0x8] sm:$0xff]  ;;  %p652_p3 = pnand %p651_p2, %p647_p13 }
  0x1d   : > { %511 = vmatpush.xpose.msk.msra.mxu0 %vm269_vm0, %v243_v1  ;;  %536 = vmatpush.xpose.msk.msra.mxu1 %vm269_vm0, %v243_v1  ;;  %v229_v24 = vld [vmem:[%s778_s10] sm:$0xff]  ;;  %v226_v26 = vld [vmem:[%s933_s1 + $0x8] sm:$0xff]  ;;  %v227_v27 = vld [vmem:[%s933_s1 + $0x10] sm:$0xff] }
  0x1e   : > { %537 = vmatpush.xpose.msk.msra.mxu2 %vm269_vm0, %v243_v1  ;;  %538 = vmatpush.xpose.msk.msra.mxu3 %vm269_vm0, %v243_v1  ;;  %v228_v28 = vld [vmem:[%s933_s1 + $0x18] sm:$0xff]  ;;  %v409_v1 = vstv %s408_s18 }
  0x1f   : > { %256 = vperm.xlu0 %621, %v246_v12  }
  0x20   : > { %266 = vperm.xlu1 %622, %v248_v13   ;;  %382 = vperm.xlu2 %623, %v372_v19  }
  0x21   : > { %512 = vmatpush.xpose.msk.msra.mxu0 %vm269_vm0, %v242_v2  ;;  %539 = vmatpush.xpose.msk.msra.mxu1 %vm269_vm0, %v242_v2 }
  0x22   : > { %540 = vmatpush.xpose.msk.msra.mxu2 %vm269_vm0, %v242_v2  ;;  %541 = vmatpush.xpose.msk.msra.mxu3 %vm269_vm0, %v242_v2 }
  0x25   : > { %513 = vmatpush.xpose.msk.msra.mxu0 %vm269_vm0, %v241_v3  ;;  %542 = vmatpush.xpose.msk.msra.mxu1 %vm269_vm0, %v241_v3 }
  0x26   : > { %543 = vmatpush.xpose.msk.msra.mxu2 %vm269_vm0, %v241_v3  ;;  %544 = vmatpush.xpose.msk.msra.mxu3 %vm269_vm0, %v241_v3 }
  0x27   : > { %387 = vperm.xlu0 %621, %v373_v16  }
  0x28   : > { %392 = vperm.xlu1 %622, %v374_v17  }
  0x29   : > { %514 = vmatpush.xpose.msk.msra.mxu0 %vm269_vm0, %v240_v4  ;;  %545 = vmatpush.xpose.msk.msra.mxu1 %vm269_vm0, %v240_v4 }
  0x2a   : > { %546 = vmatpush.xpose.msk.msra.mxu2 %vm269_vm0, %v240_v4  ;;  %547 = vmatpush.xpose.msk.msra.mxu3 %vm269_vm0, %v240_v4 }
  0x2d   : > { %515 = vmatpush.xpose.msk.msra.mxu0 %vm269_vm0, %v239_v5  ;;  %548 = vmatpush.xpose.msk.msra.mxu1 %vm269_vm0, %v239_v5 }
  0x2e   : > { %549 = vmatpush.xpose.msk.msra.mxu2 %vm269_vm0, %v239_v5  ;;  %550 = vmatpush.xpose.msk.msra.mxu3 %vm269_vm0, %v239_v5 }
  0x31   : > { %516 = vmatpush.xpose.msk.msra.mxu0 %vm269_vm0, %v238_v7  ;;  %551 = vmatpush.xpose.msk.msra.mxu1 %vm269_vm0, %v238_v7 }
  0x32   : > { %552 = vmatpush.xpose.msk.msra.mxu2 %vm269_vm0, %v238_v7  ;;  %553 = vmatpush.xpose.msk.msra.mxu3 %vm269_vm0, %v238_v7 }
  0x35   : > { %517 = vmatpush.xpose.msk.msra.mxu0 %vm269_vm0, %v237_v10  ;;  %554 = vmatpush.xpose.msk.msra.mxu1 %vm269_vm0, %v237_v10 }
  0x36   : > { %555 = vmatpush.xpose.msk.msra.mxu2 %vm269_vm0, %v237_v10  ;;  %556 = vmatpush.xpose.msk.msra.mxu3 %vm269_vm0, %v237_v10 }
  0x39   : > { %518 = vmatpush.xpose.msk.msra.mxu0 %vm269_vm0, %v236_v11  ;;  %557 = vmatpush.xpose.msk.msra.mxu1 %vm269_vm0, %v236_v11 }
  0x3a   : > { %558 = vmatpush.xpose.msk.msra.mxu2 %vm269_vm0, %v236_v11  ;;  %559 = vmatpush.xpose.msk.msra.mxu3 %vm269_vm0, %v236_v11 }
  0x3d   : > { %519 = vmatpush.xpose.msk.msra.mxu0 %vm269_vm0, %v235_v15  ;;  %560 = vmatpush.xpose.msk.msra.mxu1 %vm269_vm0, %v235_v15 }
  0x3e   : > { %561 = vmatpush.xpose.msk.msra.mxu2 %vm269_vm0, %v235_v15  ;;  %562 = vmatpush.xpose.msk.msra.mxu3 %vm269_vm0, %v235_v15 }
  0x41   : > { %520 = vmatpush.xpose.msk.msra.mxu0 %vm269_vm0, %v234_v18  ;;  %563 = vmatpush.xpose.msk.msra.mxu1 %vm269_vm0, %v234_v18 }
  0x42   : > { %564 = vmatpush.xpose.msk.msra.mxu2 %vm269_vm0, %v234_v18  ;;  %565 = vmatpush.xpose.msk.msra.mxu3 %vm269_vm0, %v234_v18 }
  0x45   : > { %521 = vmatpush.xpose.msk.msra.mxu0 %vm269_vm0, %v233_v20  ;;  %566 = vmatpush.xpose.msk.msra.mxu1 %vm269_vm0, %v233_v20 }
  0x46   : > { %567 = vmatpush.xpose.msk.msra.mxu2 %vm269_vm0, %v233_v20  ;;  %568 = vmatpush.xpose.msk.msra.mxu3 %vm269_vm0, %v233_v20 }
  0x49   : > { %522 = vmatpush.xpose.msk.msra.mxu0 %vm269_vm0, %v232_v21  ;;  %569 = vmatpush.xpose.msk.msra.mxu1 %vm269_vm0, %v232_v21 }
  0x4a   : > { %570 = vmatpush.xpose.msk.msra.mxu2 %vm269_vm0, %v232_v21  ;;  %571 = vmatpush.xpose.msk.msra.mxu3 %vm269_vm0, %v232_v21 }
  0x4d   : > { %523 = vmatpush.xpose.msk.msra.mxu0 %vm269_vm0, %v231_v22  ;;  %572 = vmatpush.xpose.msk.msra.mxu1 %vm269_vm0, %v231_v22 }
  0x4e   : > { %573 = vmatpush.xpose.msk.msra.mxu2 %vm269_vm0, %v231_v22  ;;  %574 = vmatpush.xpose.msk.msra.mxu3 %vm269_vm0, %v231_v22 }
  0x51   : > { %524 = vmatpush.xpose.msk.msra.mxu0 %vm269_vm0, %v230_v23  ;;  %575 = vmatpush.xpose.msk.msra.mxu1 %vm269_vm0, %v230_v23 }
  0x52   : > { %576 = vmatpush.xpose.msk.msra.mxu2 %vm269_vm0, %v230_v23  ;;  %577 = vmatpush.xpose.msk.msra.mxu3 %vm269_vm0, %v230_v23 }
  0x55   : > { %525 = vmatpush.xpose.msk.msra.mxu0 %vm269_vm0, %v229_v24  ;;  %578 = vmatpush.xpose.msk.msra.mxu1 %vm269_vm0, %v229_v24 }
  0x56   : > { %579 = vmatpush.xpose.msk.msra.mxu2 %vm269_vm0, %v229_v24  ;;  %580 = vmatpush.xpose.msk.msra.mxu3 %vm269_vm0, %v229_v24 }
  0x58   : > { %526 = vmatmul.msk.f32.vlgmr.msra.gmra.mxu0 %vm269_vm0, %v225_v25  ;;  %527 = vmatmul.msk.f32.vlgmr.msra.gmra.mxu1 %vm269_vm0, %v226_v26 }
  0x59   : > { %528 = vmatmul.msk.f32.vlgmr.msra.gmra.mxu2 %vm269_vm0, %v227_v27  ;;  %529 = vmatmul.msk.f32.vlgmr.msra.gmra.mxu3 %vm269_vm0, %v228_v28 }
  0x72   : > { %v378_v31 = vpop.permute.xlu2 %377 }
  0x7a   : > { %v383_v44 = vpop.permute.xlu2 %382 }
  0x89   : > { %v252_v29 = vpop.permute.xlu0 %251 }
  0x8a   : > { %v262_v30 = vpop.permute.xlu1 %261 }
  0x91   : > { %v257_v32 = vpop.permute.xlu0 %256 }
  0x92   : > { %v267_v39 = vpop.permute.xlu1 %266 }
  0x99   : > { %v388_v51 = vpop.permute.xlu0 %387 }
  0x9a   : > { %v393_v56 = vpop.permute.xlu1 %392 }
  0xd5   : > { %v347_v33 = vpop.f32.mrf.mxu0  ;;  %v350_v34 = vpop.f32.mrf.mxu1 }
  0xd6   : > { %v348_v35 = vadd.f32 %v347_v33, %v252_v29  ;;  %v351_v36 = vadd.f32 %v350_v34, %v257_v32 }
  0xd8   : > { %vm359_vm1 = vcmp.ge.f32.partialorder %v348_v35, 0.0  ;;  %v363_v37 = vmul.f32 0.1, %v348_v35  ;;  %v364_v38 = vmul.f32 0.1, %v351_v36  ;;  %vm360_vm2 = vcmp.ge.f32.partialorder %v351_v36, 0.0 }
  0xda   : > { %v367_v40 = vsel %vm359_vm1, %v348_v35, %v363_v37  ;;  %v368_v41 = vsel %vm360_vm2, %v351_v36, %v364_v38 }
  0xdb   : > { %v395_v47 = vmul.f32 %v378_v31, %v367_v40  ;;  %v396_v48 = vmul.f32 %v383_v44, %v368_v41 }
  0xdc   : > { %v353_v42 = vpop.f32.mrf.mxu2  ;;  %v356_v43 = vpop.f32.mrf.mxu3 }
  0xdd   : > { %v354_v45 = vadd.f32 %v353_v42, %v262_v30  ;;  %v357_v46 = vadd.f32 %v356_v43, %v267_v39  ;;  %v399_v54 = vadd.f32 %v396_v48, %v395_v47 }
  0xdf   : > { %vm361_vm3 = vcmp.ge.f32.partialorder %v354_v45, 0.0  ;;  %v365_v49 = vmul.f32 0.1, %v354_v45  ;;  %vm362_vm4 = vcmp.ge.f32.partialorder %v357_v46, 0.0  ;;  %v366_v50 = vmul.f32 0.1, %v357_v46 }
  0xe1   : > { %v369_v52 = vsel %vm361_vm3, %v354_v45, %v365_v49  ;;  %v370_v53 = vsel %vm362_vm4, %v357_v46, %v366_v50 }
  0xe2   : > { %v397_v55 = vmul.f32 %v388_v51, %v369_v52  ;;  %v398_v58 = vmul.f32 %v393_v56, %v370_v53 }
  0xe4   : > { %v400_v57 = vadd.f32 %v399_v54, %v397_v55 }
  0xe6   : > { %v401_v59 = vadd.f32 %v400_v57, %v398_v58 }
  0xe8   : > { %v402_v60 = vrot.slane %v401_v59, 4 }
  0xea   : > { %v403_v61 = vadd.f32 %v402_v60, %v401_v59 }
  0xec   : > { %v404_v62 = vrot.slane %v403_v61, 2 }
  0xee   : > { %v405_v63 = vadd.f32 %v404_v62, %v403_v61 }
  0xf0   : > { %v406_v0 = vrot.slane %v405_v63, 1 }
  0xf2   : > { %v407_v2 = vadd.f32 %v406_v0, %v405_v63 }
  0xf4   : > { %v410_v3 = vadd.f32 %v409_v1, %v407_v2 }
  0xf6   : > { %v411_v4 = vand.u32 2147483647, %v410_v3 }
  0xf8   : > { %v412_v5 = vmax.f32 %v411_v4, 0.0 }
  0xfa   : > { %v413_v6 = vmin.f32 %v412_v5, 40.0 }
  0xfc   : > { %v414_v7 = vsub.f32 2.0, %v413_v6 }
  0xfe   : > { %v530_v8 = vmul.f32 -2.0, %v414_v7 }
 0x100   : > { %v417_v9 = vmul.f32 1.442695, %v530_v8 }
 0x102   : > { %624 = vpow2.f32 %v417_v9 }
 0x108   : > { %v625_v10 = vpop.eup %624 }
 0x109   : > { %v419_v11 = vadd.f32 1.0, %v625_v10 }
 0x10b   : > { %626 = vrcp.f32 %v419_v11  ;;  %v431_v15 = vand.u32 2147483648, %v419_v11  ;;  %v429_v17 = vand.u32 2147483647, %v419_v11  ;;  %vm425_vm6 = vweird.f32 %v419_v11 }
 0x10d   : > { %v432_v19 = vor.u32 1.1754944e-38, %v431_v15  ;;  %vm430_vm8 = vcmp.eq.f32.partialorder %v429_v17, 8.507059e+37 }
 0x111   : > { %v627_v12 = vpop.eup %626 }
 0x112   : > { %v421_v13 = vmul.f32 %v627_v12, %v419_v11  ;;  %vm426_vm5 = vweird.f32 %v627_v12 }
 0x113   : > { %vm427_vm7 = vmor %vm425_vm6, %vm426_vm5 }
 0x114   : > { %v422_v14 = vsub.f32 1.0, %v421_v13 }
 0x116   : > { %v423_v16 = vmul.f32 %v627_v12, %v422_v14 }
 0x118   : > { %v424_v18 = vadd.f32 %v627_v12, %v423_v16 }
 0x11a   : > { %v428_v20 = vsel %vm427_vm7, %v627_v12, %v424_v18 }
 0x11b   : > { %v433_v21 = vsel %vm430_vm8, %v432_v19, %v428_v20 }
 0x11c   : > { %435 = vst [vmem:[%s218_s6] sm:$0x1] %v433_v21 }
 0x11d   : > { %655 = shalt.err (!%p652_p3)
}
 0x11e   : > { %581 = dma.vmem_to_hbm [thread:$0]  (%p764_p5), %s448_s7, 16, %s450_s8, %s437_s9  }
 0x11f PF: > { %p587_p4 = scmp.ge.s32.totalorder %s690_s23, 2  ;;  %s461_s10 = sand.u32 1, %s678_s20  }
 0x120   : > { %s462_s17 = scalar_lea.sflag [#allocation4], %s461_s10 }
 0x121   : > { %p584_p7 = pnand %p587_p4, %p768_p6 }
 0x123   : > { %p585_p8 = pneg %p584_p7 }
 0x125   : > { %673 = dma.done.wait (%p585_p8), %s462_s17, 16  }
 0x126   : > { %675 = vsyncadd (%p585_p8), %s462_s17, 4294967280  ;;  %p16_p9 = scmp.ge.s32.totalorder %s751_s25, 4   ;;  %s940_s20 = smov %s682_s21 }
 0x127   : > { %s941_s21 = smov %s686_s22  ;;  %s942_s22 = smov %s762_s28 }
 0x128   : > { %s943_s23 = smov %s751_s25  ;;  %18 = sbr.rel (!%p16_p9) target bundleno = 5 (0x5), region = 75 }
 0x12d   :  { %467 = vsyncpa [#allocation4], 1 }
 0x12e   :  { %469 = vsyncpa [#allocation4 + $0x1], 1 }

</bundles_post_ra>
